<compile_context>
chip_gen: v7x
topology: tpu7x:2x2x1
jax: 0.10.0
libtpu: 0.0.40
codegen_flags: <defaults>
</compile_context>

<pallas_src>
import jax
import jax.numpy as jnp
from jax.experimental import pallas as pl
from jax.experimental.pallas import tpu as pltpu

DIM = 7                      # torch.nn.Linear in_features
OUT = 32                     # torch.nn.Linear out_features
ROW_FOLD = 16                # batch rows folded into the lane axis
LANES_IN = ROW_FOLD * DIM    # 112  (full last dim of the folded input)
LANES_OUT = ROW_FOLD * OUT   # 512  (lane-dense output, multiple of 128)

TARGET_MIN_STEPS = 4                  # keep >=4 grid steps when possible (megacore + pipelining)
MAX_BLOCK_BATCH_ROWS = 65536          # 4096 packed rows/step -> ~20.5 MiB double-buffered VMEM
VMEM_LIMIT_BYTES = 48 * 1024 * 1024   # <= v7x 64 MiB/TC; above v5e's 16 MiB scoped default
SMALL_BATCH_FASTPATH = 4096           # below this, dispatch overhead dominates -> plain jnp


def _round_up(a, m):
    return ((a + m - 1) // m) * m


def _encoder_kernel(x_ref, w_ref, b_ref, o_ref):
    # x_ref: (block_rows, 112)  -- 16 input rows (width 7) folded per VMEM row
    # w_ref: (112, 512)         -- kron(I_16, W^T); constant index_map -> VMEM resident
    # b_ref: (1, 512)           -- bias tiled 16x; broadcast add on the VPU (free slot)
    # o_ref: (block_rows, 512)  -- 16 output rows (width 32) folded per VMEM row (unmasked vst)
    acc = jnp.dot(x_ref[...], w_ref[...],
                  preferred_element_type=jnp.float32,
                  precision=jax.lax.Precision.HIGHEST)   # pin true-f32 MXU path
    o_ref[...] = (acc + b_ref[...]).astype(o_ref.dtype)


class PallasEncoder:
    """Pallas equivalent of torch.nn.Linear(DIM, OUT). Weight prep done once here."""

    def __init__(self, w, b):
        w = jnp.asarray(w, jnp.float32)          # (OUT, DIM), torch layout
        b = jnp.asarray(b, jnp.float32)          # (OUT,)
        self.w_t = w.T                           # (DIM, OUT) -- small-batch fast path
        self.b = b
        # One-time prep, hoisted out of the per-call path (perf review item):
        self.w_big = jnp.kron(jnp.eye(ROW_FOLD, dtype=jnp.float32), w.T)   # (112, 512)
        self.b_big = jnp.tile(b, ROW_FOLD).reshape(1, LANES_OUT)           # (1, 512)

    def __call__(self, x, *, max_block_rows=MAX_BLOCK_BATCH_ROWS,
                 small_batch_threshold=SMALL_BATCH_FASTPATH,
                 force_kernel=False, out_dtype=jnp.float32):
        x = jnp.asarray(x, jnp.float32)
        B = x.shape[0]

        if (not force_kernel) and B < small_batch_threshold:
            # Tiny batches: pallas dispatch + pipeline warmup would dwarf ~450 FLOPs.
            return (x @ self.w_t + self.b).astype(out_dtype)

        # Pad batch only to a multiple of 128 (keeps folded rows sublane-aligned);
        # this is the only possible wrapper copy, and it is skipped when B % 128 == 0.
        bp = _round_up(B, 128)
        if bp != B:
            x = jnp.pad(x, ((0, bp - B), (0, 0)))
        # Free row-major reshape: 16 rows of 7 -> one 112-lane row. No ones-concat.
        xp = x.reshape(bp // ROW_FOLD, LANES_IN)
        packed_rows = bp // ROW_FOLD                       # multiple of 8

        # Tile sizing: cap per-step footprint (v7x 64 MiB/TC budget), keep >= 4 grid
        # steps when possible so both v7x TensorCores get work and pipelining overlaps.
        max_prows = max(8, (max_block_rows // ROW_FOLD) // 8 * 8)
        steps = max(pl.cdiv(packed_rows, max_prows),
                    min(TARGET_MIN_STEPS, packed_rows // 8), 1)
        block_prows = min(_round_up(pl.cdiv(packed_rows, steps), 8), packed_rows)
        grid = (pl.cdiv(packed_rows, block_prows),)        # ragged last block handled by Pallas

        out = pl.pallas_call(
            _encoder_kernel,
            out_shape=jax.ShapeDtypeStruct((packed_rows, LANES_OUT), out_dtype),
            grid_spec=pltpu.PrefetchScalarGridSpec(
                num_scalar_prefetch=0,
                grid=grid,
                in_specs=[
                    pl.BlockSpec((block_prows, LANES_IN), lambda i: (i, 0)),
                    # constant index_map -> weight / bias stay VMEM-resident across steps
                    # (double-buffer cost ~0.45 MiB total; negligible vs the 48 MiB budget)
                    pl.BlockSpec((LANES_IN, LANES_OUT), lambda i: (0, 0)),
                    pl.BlockSpec((1, LANES_OUT), lambda i: (0, 0)),
                ],
                out_specs=pl.BlockSpec((block_prows, LANES_OUT), lambda i: (i, 0)),
            ),
            compiler_params=pltpu.CompilerParams(
                dimension_semantics=("parallel",),      # megacore-shardable on v7x
                vmem_limit_bytes=VMEM_LIMIT_BYTES,
            ),
        )(xp, self.w_big, self.b_big)

        # Undo the lane fold (free row-major reshape) and drop padding rows.
        return out.reshape(bp, OUT)[:B]


if __name__ == "__main__":
    key = jax.random.PRNGKey(0)
    k_x, k_w, k_b = jax.random.split(key, 3)

    # Deterministic init mimicking torch.nn.Linear default:
    # U(-1/sqrt(in_features), 1/sqrt(in_features)), torch weight layout (out, in).
    bound = 1.0 / (DIM ** 0.5)
    w = jax.random.uniform(k_w, (OUT, DIM), minval=-bound, maxval=bound, dtype=jnp.float32)
    b = jax.random.uniform(k_b, (OUT,), minval=-bound, maxval=bound, dtype=jnp.float32)

    enc = PallasEncoder(w, b)

    def ref(xx):
        return xx @ w.T + b

    # 1) Tiny batch, forced through the Pallas kernel (single grid step).
    x1 = jax.random.normal(k_x, (8, DIM), dtype=jnp.float32)
    y1 = enc(x1, force_kernel=True)
    jax.block_until_ready(y1)
    assert y1.shape == (8, OUT)
    assert jnp.allclose(y1, ref(x1), atol=1e-5, rtol=1e-5)

    # 2) Batch not divisible by 16/128: exercises pad + lane fold + 2-step grid.
    x2 = jax.random.normal(k_x, (200, DIM), dtype=jnp.float32)
    y2 = enc(x2, force_kernel=True)
    jax.block_until_ready(y2)
    assert jnp.allclose(y2, ref(x2), atol=1e-5, rtol=1e-5)

    # 3) Grid that does not divide the folded rows (40 rows, 16-row blocks, 3 steps):
    #    exercises the ragged last block without padding B up to a tile multiple.
    x3 = jax.random.normal(k_x, (640, DIM), dtype=jnp.float32)
    y3 = enc(x3, force_kernel=True)
    jax.block_until_ready(y3)
    assert jnp.allclose(y3, ref(x3), atol=1e-5, rtol=1e-5)

    # 4) Default small-batch fast path (no pallas dispatch below the threshold).
    y4 = enc(x1)
    jax.block_until_ready(y4)
    assert jnp.allclose(y4, ref(x1), atol=1e-5, rtol=1e-5)

    print("KERNEL_OK")
</pallas_src>

<mosaic_0001>
module attributes {stable_mosaic.version = 11 : i64} {
  func.func @_encoder_kernel(%arg0: i32, %arg1: memref<8x112xf32, #tpu.memory_space<vmem>>, %arg2: memref<112x512xf32, #tpu.memory_space<vmem>>, %arg3: memref<1x512xf32, #tpu.memory_space<vmem>>, %arg4: memref<8x512xf32, #tpu.memory_space<vmem>>) attributes {dimension_semantics = [#tpu.dimension_semantics<parallel>], iteration_bounds = array<i64: 1>, scalar_prefetch = 0 : i64, scratch_operands = 0 : i64, tpu.core_type = #tpu.core_type<tc>, window_params = [{transform_indices = @transform_0, window_bounds = array<i64: 8, 112>}, {pipeline_mode = #tpu.pipeline_mode<synchronous>, transform_indices = @transform_1, window_bounds = array<i64: 112, 512>}, {pipeline_mode = #tpu.pipeline_mode<synchronous>, transform_indices = @transform_2, window_bounds = array<i64: 1, 512>}, {transform_indices = @transform_3, window_bounds = array<i64: 8, 512>}]} {
    %c0 = arith.constant 0 : index
    %c0_0 = arith.constant 0 : index
    %0 = vector.load %arg1[%c0, %c0_0] : memref<8x112xf32, #tpu.memory_space<vmem>>, vector<8x112xf32>
    %c0_1 = arith.constant 0 : index
    %c0_2 = arith.constant 0 : index
    %1 = vector.load %arg2[%c0_1, %c0_2] : memref<112x512xf32, #tpu.memory_space<vmem>>, vector<112x512xf32>
    %cst = arith.constant dense<0.000000e+00> : vector<8x512xf32>
    %2 = tpu.matmul %0, %1, %cst {dimension_numbers = #tpu.dot_dimension_numbers<[1], [0], [0], [1], [0, 0, 1, 1], [], []>, precision = #tpu.contract_precision<fp32>} : vector<8x112xf32>, vector<112x512xf32>, vector<8x512xf32> -> vector<8x512xf32>
    %c0_3 = arith.constant 0 : index
    %c0_4 = arith.constant 0 : index
    %3 = vector.load %arg3[%c0_3, %c0_4] : memref<1x512xf32, #tpu.memory_space<vmem>>, vector<1x512xf32>
    %4 = vector.broadcast %3 : vector<1x512xf32> to vector<8x512xf32>
    %5 = arith.addf %2, %4 : vector<8x512xf32>
    %c0_5 = arith.constant 0 : index
    %c0_6 = arith.constant 0 : index
    %6 = vector.load %arg4[%c0_5, %c0_6] : memref<8x512xf32, #tpu.memory_space<vmem>>, vector<8x512xf32>
    tpu.vector_store %arg4[%c0_5, %c0_6], %5 {strides = array<i32>} : memref<8x512xf32, #tpu.memory_space<vmem>>, vector<8x512xf32>,
    return
  }
  func.func @transform_0(%arg0: i32) -> (i32, i32) {
    %c0_i32 = arith.constant 0 : i32
    %c0_i32_0 = arith.constant 0 : i32
    return %arg0, %c0_i32 : i32, i32
  }
  func.func @transform_1(%arg0: i32) -> (i32, i32) {
    %c0_i32 = arith.constant 0 : i32
    %c0_i32_0 = arith.constant 0 : i32
    %c0_i32_1 = arith.constant 0 : i32
    return %c0_i32, %c0_i32_0 : i32, i32
  }
  func.func @transform_2(%arg0: i32) -> (i32, i32) {
    %c0_i32 = arith.constant 0 : i32
    %c0_i32_0 = arith.constant 0 : i32
    %c0_i32_1 = arith.constant 0 : i32
    return %c0_i32, %c0_i32_0 : i32, i32
  }
  func.func @transform_3(%arg0: i32) -> (i32, i32) {
    %c0_i32 = arith.constant 0 : i32
    %c0_i32_0 = arith.constant 0 : i32
    return %arg0, %c0_i32 : i32, i32
  }
}

</mosaic_0001>

<bundles_post_ra>
// kernel: tpu_custom_call.1
= control target key start
LH: loop header
LB: loop body
LE: loop exit
PB: predicated region body
PF: predicated region fallthrough
CT: control target
= control target key end

     0   :  { %8 = vsyncpa [#allocation3], 0  ;;  %s3021_s0 = inlined_call_operand.hbm [shape: f32[8,112], index: 0, kind: input, shape index: {}]   ;;  %s3022_s1 = inlined_call_operand.hbm [shape: f32[112,512], index: 1, kind: input, shape index: {}]   ;;  %s3023_s2 = inlined_call_operand.vmem [shape: f32[1,512], index: 2, kind: input, shape index: {}]   ;;  %s3024_s3 = inlined_call_operand.hbm [shape: f32[8,512], index: 3, kind: output, shape index: {}]  }
   0x1   :  { %9 = vsyncpa [#allocation6], 0 }
   0x2   :  { %10 = vsyncpa [#allocation4], 0  ;;  %s2188_s12 = smov [#allocation2]   ;;  %s2189_s14 = smov [#allocation5]  }
   0x3   :  { %s17_s13 = sshll.u32 %s2188_s12, 4  ;;  %s26_s15 = sshll.u32 %s2189_s14, 4  ;;  %s18_s13 = int_to_ptr.vmem [resolvable:$true] %s17_s13  ;;  %s2214_s15 = int_to_ptr.vmem [resolvable:$true] %s26_s15 }
   0x4   :  { %s2116_s18 = scalar_lea.hbm %s3021_s0, 128 }
   0x5   :  { %p2117_p0 = scmp.ne.s32.totalorder %s3021_s0, %s2116_s18  ;;  %p2120_p1 = scmp.lt.u32.totalorder %s2116_s18, %s3021_s0 }
   0x7   :  { %p2122_p2 = pnand %p2120_p1, %p2117_p0 }
   0x9   :  { %2125 = shalt.err (!%p2122_p2)
}
   0xa   :  { %s2126_s23 = scalar_lea.vmem %s18_s13, 128  ;;  %p2131_p4 = scmp.lt.s32.totalorder %s18_s13, %s18_s13 }
   0xb   :  { %p2127_p3 = scmp.ne.s32.totalorder %s18_s13, %s2126_s23  ;;  %p2132_p5 = scmp.lt.s32.totalorder %s2126_s23, %s2126_s23 }
   0xd   :  { %p2133_p6 = por %p2132_p5, %p2131_p4 }
   0xf   :  { %p2134_p7 = pnand %p2133_p6, %p2127_p3 }
  0x11   :  { %2137 = shalt.err (!%p2134_p7)
}
  0x12   :  { %20 = dma.hbm_to_vmem [thread:$0]  %s3021_s0, 128, %s18_s13, [#allocation3]  }
  0x13   :  { %s2138_s28 = scalar_lea.hbm %s3022_s1, 7168 }
  0x14   :  { %p2139_p8 = scmp.ne.s32.totalorder %s3022_s1, %s2138_s28  ;;  %p2142_p9 = scmp.lt.u32.totalorder %s2138_s28, %s3022_s1 }
  0x16   :  { %p2144_p10 = pnand %p2142_p9, %p2139_p8 }
  0x18   :  { %2147 = shalt.err (!%p2144_p10)
}
  0x19   :  { %s2148_s6 = scalar_lea.vmem %s2214_s15, 7168  ;;  %p2153_p12 = scmp.lt.s32.totalorder %s2214_s15, %s2214_s15 }
  0x1a   :  { %p2149_p11 = scmp.ne.s32.totalorder %s2214_s15, %s2148_s6  ;;  %p2154_p13 = scmp.lt.s32.totalorder %s2148_s6, %s2148_s6 }
  0x1c   :  { %p2155_p0 = por %p2154_p13, %p2153_p12 }
  0x1e   :  { %p2156_p1 = pnand %p2155_p0, %p2149_p11 }
  0x20   :  { %2159 = shalt.err (!%p2156_p1)
}
  0x21   :  { %s2190_s0 = smov 512   ;;  %s2191_s7 = smov 32  }
  0x22   :  { %32 = dma.hbm_to_vmem [thread:$0]  %s3022_s1, 7168, %s2214_s15, [#allocation6], %s2190_s0, %s2190_s0, %s2191_s7  }
  0x23   :  { %2182 = dma.done.wait [#allocation3], 128  }
  0x24   :  { %2183 = vsyncadd [#allocation3], 4294967168 }
  0x25   :  { %2184 = dma.done.wait [#allocation6], 7168  }
  0x26   :  { %2185 = vsyncadd [#allocation6], 4294960128  ;;  %v3025_v0 = vmov 0.0   ;;  %v43_v1 = vld [vmem:[#allocation5 + $0x8] sm:$0xff]  ;;  %v45_v3 = vld [vmem:[#allocation5 + $0x18] sm:$0xff]  ;;  %vm120_vm0 = vcmask 916480  }
  0x27   :  { %216 = vmatprep.mubr.f32.mxu0 %v3025_v0  ;;  %1019 = vmatprep.mubr.f32.mxu1 %v3025_v0  ;;  %v47_v2 = vld [vmem:[#allocation5 + $0x28] sm:$0xff]  ;;  %v124_v4 = vand.u32 4294901760, %v43_v1  ;;  %v49_v6 = vld [vmem:[#allocation5 + $0x38] sm:$0xff]  ;;  %v927_v7 = vand.u32 4294901760, %v45_v3  ;;  %v42_v8 = vld [vmem:[#allocation5] sm:$0xff]  ;;  %s2193_s11 = smov [#allocation7]  }
  0x28   :  { %v128_v5 = vand.u32 4294901760, %v47_v2  ;;  %v46_v9 = vld [vmem:[#allocation5 + $0x20] sm:$0xff]  ;;  %v931_v10 = vand.u32 4294901760, %v49_v6  ;;  %v126_v11 = vand.u32 4294901760, %v42_v8  ;;  %v44_v13 = vld [vmem:[#allocation5 + $0x10] sm:$0xff]  ;;  %v51_v15 = vld [vmem:[#allocation5 + $0x48] sm:$0xff] }
  0x29   :  { %v130_v12 = vand.u32 4294901760, %v46_v9  ;;  %v48_v14 = vld [vmem:[#allocation5 + $0x30] sm:$0xff]  ;;  %v2249_v17 = vsub.f32 %v43_v1, %v124_v4  ;;  %v2253_v19 = vsub.f32 %v45_v3, %v927_v7  ;;  %v55_v20 = vld [vmem:[#allocation5 + $0x68] sm:$0xff]  ;;  %v53_v21 = vld [vmem:[#allocation5 + $0x58] sm:$0xff]  ;;  %v929_v29 = vand.u32 4294901760, %v44_v13  ;;  %s1740_s12 = sshll.u32 %s2193_s11, 4  ;;  %s1741_s12 = int_to_ptr.vmem [resolvable:$true] %s1740_s12 }
  0x2a   :  { %v2247_v16 = vpack.c.bf16 %v128_v5, %v124_v4  ;;  %v2251_v18 = vsub.f32 %v47_v2, %v128_v5  ;;  %v57_v22 = vld [vmem:[#allocation5 + $0x78] sm:$0xff]  ;;  %v2255_v23 = vpack.c.bf16 %v931_v10, %v927_v7  ;;  %v2257_v24 = vsub.f32 %v49_v6, %v931_v10  ;;  %v50_v27 = vld [vmem:[#allocation5 + $0x40] sm:$0xff]  ;;  %v52_v37 = vld [vmem:[#allocation5 + $0x50] sm:$0xff]  ;;  %p2165_p3 = scmp.lt.s32.totalorder %s1741_s12, %s1741_s12 }
  0x2b   :  { %3190 = vst [vmem:[#allocation13_spill] sm:$0xff] %v2253_v19  ;;  %v2259_v25 = vpack.c.bf16 %v130_v12, %v126_v11  ;;  %v2261_v26 = vsub.f32 %v42_v8, %v126_v11  ;;  %v2264_v28 = vsub.f32 %v46_v9, %v130_v12  ;;  %v933_v30 = vand.u32 4294901760, %v48_v14  ;;  %v54_v32 = vld [vmem:[#allocation5 + $0x60] sm:$0xff]  ;;  %v56_v38 = vld [vmem:[#allocation5 + $0x70] sm:$0xff]  ;;  %v59_v43 = vld [vmem:[#allocation5 + $0x88] sm:$0xff] }
  0x2c   :  { %3188 = vst [vmem:[#allocation11_spill] sm:$0xff] %v2247_v16  ;;  %3189 = vst [vmem:[#allocation12_spill] sm:$0xff] %v2251_v18  ;;  %1751 = vmatprep.subr.bf16.mxu0 %v2247_v16  ;;  %v132_v31 = vand.u32 4294901760, %v51_v15  ;;  %1919 = vmatprep.subr.bf16.mxu1 %v2255_v23  ;;  %v136_v33 = vand.u32 4294901760, %v55_v20  ;;  %v935_v34 = vand.u32 4294901760, %v53_v21  ;;  %v939_v35 = vand.u32 4294901760, %v57_v22 }
  0x2d   :  { %3191 = vst [vmem:[#allocation14_spill] sm:$0xff] %v2255_v23  ;;  %3192 = vst [vmem:[#allocation15_spill] sm:$0xff] %v2257_v24  ;;  %1753 = vmatpush1.bf16.msra.mxu0 %v2259_v25  ;;  %v134_v36 = vand.u32 4294901760, %v50_v27  ;;  %v2268_v39 = vpack.c.bf16 %v933_v30, %v929_v29  ;;  %v2270_v40 = vsub.f32 %v44_v13, %v929_v29  ;;  %v63_v44 = vld [vmem:[#allocation5 + $0xa8] sm:$0xff]  ;;  %v61_v45 = vld [vmem:[#allocation5 + $0x98] sm:$0xff]  ;;  %v138_v52 = vand.u32 4294901760, %v54_v32 }
  0x2e   :  { %3193 = vst [vmem:[#allocation16_spill] sm:$0xff] %v2259_v25  ;;  %3194 = vst [vmem:[#allocation17_spill] sm:$0xff] %v2264_v28  ;;  %v2272_v41 = vsub.f32 %v48_v14, %v933_v30  ;;  %v2274_v42 = vsub.f32 %v51_v15, %v132_v31  ;;  %v2276_v46 = vpack.c.bf16 %v136_v33, %v132_v31  ;;  %v65_v50 = vld [vmem:[#allocation5 + $0xb8] sm:$0xff]  ;;  %v937_v54 = vand.u32 4294901760, %v52_v37  ;;  %v58_v59 = vld [vmem:[#allocation5 + $0x80] sm:$0xff] }
  0x2f   :  { %3195 = vst [vmem:[#allocation18_spill] sm:$0xff] %v2268_v39  ;;  %v2278_v47 = vsub.f32 %v55_v20, %v136_v33  ;;  %v2280_v48 = vpack.c.bf16 %v939_v35, %v935_v34  ;;  %v2282_v49 = vsub.f32 %v53_v21, %v935_v34  ;;  %1921 = vmatpush1.bf16.msra.mxu1 %v2268_v39  ;;  %v941_v55 = vand.u32 4294901760, %v56_v38  ;;  %v62_v60 = vld [vmem:[#allocation5 + $0xa0] sm:$0xff]  ;;  %v60_v2 = vld [vmem:[#allocation5 + $0x90] sm:$0xff]  ;;  %v67_v4 = vld [vmem:[#allocation5 + $0xc8] sm:$0xff] }
  0x30   :  { %3196 = vst [vmem:[#allocation19_spill] sm:$0xff] %v2276_v46  ;;  %v2285_v51 = vsub.f32 %v57_v22, %v939_v35  ;;  %v2287_v53 = vsub.f32 %v50_v27, %v134_v36  ;;  %1755 = vmatprep.subr.bf16.mxu0 %v2276_v46  ;;  %v140_v56 = vand.u32 4294901760, %v59_v43  ;;  %v144_v57 = vand.u32 4294901760, %v63_v44  ;;  %v64_v3 = vld [vmem:[#allocation5 + $0xb0] sm:$0xff]  ;;  %v71_v9 = vld [vmem:[#allocation5 + $0xe8] sm:$0xff]  ;;  %v69_v10 = vld [vmem:[#allocation5 + $0xd8] sm:$0xff] }
  0x31   :  { %3197 = vst [vmem:[#allocation20_spill] sm:$0xff] %v2280_v48  ;;  %1923 = vmatprep.subr.bf16.mxu1 %v2280_v48  ;;  %v943_v58 = vand.u32 4294901760, %v61_v45  ;;  %v2291_v61 = vpack.c.bf16 %v138_v52, %v134_v36  ;;  %v2293_v62 = vsub.f32 %v54_v32, %v138_v52  ;;  %v2295_v63 = vsub.f32 %v52_v37, %v937_v54  ;;  %v73_v11 = vld [vmem:[#allocation5 + $0xf8] sm:$0xff]  ;;  %v66_v33 = vld [vmem:[#allocation5 + $0xc0] sm:$0xff]  ;;  %v84_v39 = vld [vmem:[#allocation5 + $0x150] sm:$0xff] }
  0x32   :  { %3198 = vst [vmem:[#allocation21_spill] sm:$0xff] %v2285_v51  ;;  %v947_v1 = vand.u32 4294901760, %v65_v50  ;;  %v2297_v5 = vpack.c.bf16 %v941_v55, %v937_v54  ;;  %v2299_v6 = vsub.f32 %v56_v38, %v941_v55  ;;  %v2301_v7 = vpack.c.bf16 %v144_v57, %v140_v56  ;;  %v70_v38 = vld [vmem:[#allocation5 + $0xe0] sm:$0xff]  ;;  %v75_v55 = vld [vmem:[#allocation5 + $0x108] sm:$0xff]  ;;  %v85_v48 = vld [vmem:[#allocation5 + $0x158] sm:$0xff] }
  0x33   :  { %3199 = vst [vmem:[#allocation22_spill] sm:$0xff] %v2291_v61  ;;  %v2303_v8 = vsub.f32 %v59_v43, %v140_v56  ;;  %1757 = vmatpush1.bf16.msra.mxu0 %v2291_v61  ;;  %v2306_v12 = vsub.f32 %v63_v44, %v144_v57  ;;  %v2310_v14 = vsub.f32 %v61_v45, %v943_v58  ;;  %v142_v20 = vand.u32 4294901760, %v58_v59  ;;  %v68_v43 = vld [vmem:[#allocation5 + $0xd0] sm:$0xff]  ;;  %v79_v56 = vld [vmem:[#allocation5 + $0x128] sm:$0xff]  ;;  %v77_v57 = vld [vmem:[#allocation5 + $0x118] sm:$0xff] }
  0x34   :  { %3200 = vst [vmem:[#allocation23_spill] sm:$0xff] %v2297_v5  ;;  %3201 = vst [vmem:[#allocation24_spill] sm:$0xff] %v2301_v7  ;;  %v2308_v13 = vpack.c.bf16 %v947_v1, %v943_v58  ;;  %v2312_v15 = vsub.f32 %v65_v50, %v947_v1  ;;  %1925 = vmatpush1.bf16.msra.mxu1 %v2297_v5  ;;  %1759 = vmatprep.subr.bf16.mxu0 %v2301_v7  ;;  %v146_v21 = vand.u32 4294901760, %v62_v60  ;;  %v72_v44 = vld [vmem:[#allocation5 + $0xf0] sm:$0xff]  ;;  %v78_v0 = vld [vmem:[#allocation5 + $0x120] sm:$0xff] }
  0x35   :  { %v945_v22 = vand.u32 4294901760, %v60_v2  ;;  %v949_v27 = vand.u32 4294901760, %v64_v3  ;;  %v148_v29 = vand.u32 4294901760, %v67_v4  ;;  %v152_v30 = vand.u32 4294901760, %v71_v9  ;;  %v88_v16 = vld [vmem:[#allocation5 + $0x170] sm:$0xff] }
  0x36   :  { %3202 = vst [vmem:[#allocation25_spill] sm:$0xff] %v2308_v13  ;;  %1927 = vmatprep.subr.bf16.mxu1 %v2308_v13  ;;  %v951_v31 = vand.u32 4294901760, %v69_v10  ;;  %v955_v32 = vand.u32 4294901760, %v73_v11  ;;  %v2317_v34 = vpack.c.bf16 %v146_v21, %v142_v20  ;;  %v2319_v35 = vsub.f32 %v58_v59, %v142_v20  ;;  %v87_v13 = vld [vmem:[#allocation5 + $0x168] sm:$0xff] }
  0x37   :  { %v2321_v36 = vsub.f32 %v62_v60, %v146_v21  ;;  %v2323_v37 = vpack.c.bf16 %v949_v27, %v945_v22  ;;  %v2325_v45 = vsub.f32 %v60_v2, %v945_v22  ;;  %v2327_v50 = vsub.f32 %v64_v3, %v949_v27  ;;  %v81_v21 = vld [vmem:[#allocation5 + $0x138] sm:$0xff] }
  0x38   :  { %3203 = vst [vmem:[#allocation26_spill] sm:$0xff] %v2317_v34  ;;  %v2329_v52 = vpack.c.bf16 %v152_v30, %v148_v29  ;;  %v2331_v54 = vsub.f32 %v67_v4, %v148_v29  ;;  %1761 = vmatpush1.bf16.msra.mxu0 %v2317_v34  ;;  %v2335_v58 = vsub.f32 %v71_v9, %v152_v30  ;;  %v150_v1 = vand.u32 4294901760, %v66_v33  ;;  %v74_v30 = vld [vmem:[#allocation5 + $0x100] sm:$0xff]  ;;  %v83_v34 = vld [vmem:[#allocation5 + $0x148] sm:$0xff] }
  0x39   :  { %3204 = vst [vmem:[#allocation27_spill] sm:$0xff] %v2323_v37  ;;  %1929 = vmatpush1.bf16.msra.mxu1 %v2323_v37  ;;  %v2337_v59 = vpack.c.bf16 %v955_v32, %v951_v31  ;;  %v2339_v60 = vsub.f32 %v69_v10, %v951_v31  ;;  %v2342_v2 = vsub.f32 %v73_v11, %v955_v32  ;;  %v154_v3 = vand.u32 4294901760, %v70_v38  ;;  %v76_v10 = vld [vmem:[#allocation5 + $0x110] sm:$0xff] }
  0x3a   :  { %3205 = vst [vmem:[#allocation28_spill] sm:$0xff] %v2329_v52  ;;  %1763 = vmatprep.subr.bf16.mxu0 %v2329_v52  ;;  %v953_v4 = vand.u32 4294901760, %v68_v43  ;;  %v957_v20 = vand.u32 4294901760, %v72_v44  ;;  %v2345_v22 = vsub.f32 %v66_v33, %v150_v1  ;;  %v156_v27 = vand.u32 4294901760, %v75_v55  ;;  %v80_v52 = vld [vmem:[#allocation5 + $0x130] sm:$0xff] }
  0x3b   :  { %3206 = vst [vmem:[#allocation29_spill] sm:$0xff] %v2337_v59  ;;  %1931 = vmatprep.subr.bf16.mxu1 %v2337_v59  ;;  %v160_v9 = vand.u32 4294901760, %v79_v56  ;;  %v959_v29 = vand.u32 4294901760, %v77_v57  ;;  %v2347_v31 = vpack.c.bf16 %v154_v3, %v150_v1  ;;  %v2349_v37 = vsub.f32 %v70_v38, %v154_v3 }
  0x3c   :  { %v2351_v11 = vpack.c.bf16 %v957_v20, %v953_v4  ;;  %v2353_v32 = vsub.f32 %v68_v43, %v953_v4  ;;  %v2355_v59 = vsub.f32 %v72_v44, %v957_v20  ;;  %v2359_v5 = vsub.f32 %v75_v55, %v156_v27  ;;  %v89_v55 = vld [vmem:[#allocation5 + $0x178] sm:$0xff] }
  0x3d   :  { %3207 = vst [vmem:[#allocation30_spill] sm:$0xff] %v2347_v31  ;;  %v2357_v33 = vpack.c.bf16 %v160_v9, %v156_v27  ;;  %v2361_v7 = vsub.f32 %v79_v56, %v160_v9  ;;  %1765 = vmatpush1.bf16.msra.mxu0 %v2347_v31  ;;  %v963_v38 = vand.u32 4294901760, %v81_v21  ;;  %v2365_v1 = vsub.f32 %v77_v57, %v959_v29  ;;  %v82_v57 = vld [vmem:[#allocation5 + $0x140] sm:$0xff] }
  0x3e   :  { %3208 = vst [vmem:[#allocation31_spill] sm:$0xff] %v2351_v11  ;;  %3210 = vst [vmem:[#allocation33_spill] sm:$0xff] %v2359_v5  ;;  %1933 = vmatpush1.bf16.msra.mxu1 %v2351_v11  ;;  %v158_v43 = vand.u32 4294901760, %v74_v30  ;;  %v162_v3 = vand.u32 4294901760, %v78_v0  ;;  %v961_v4 = vand.u32 4294901760, %v76_v10  ;;  %v965_v44 = vand.u32 4294901760, %v80_v52 }
  0x3f   :  { %3209 = vst [vmem:[#allocation32_spill] sm:$0xff] %v2357_v33  ;;  %3211 = vst [vmem:[#allocation34_spill] sm:$0xff] %v2361_v7  ;;  %1767 = vmatprep.subr.bf16.mxu0 %v2357_v33  ;;  %v164_v20 = vand.u32 4294901760, %v83_v34  ;;  %v168_v61 = vand.u32 4294901760, %v87_v13  ;;  %v2368_v27 = vpack.c.bf16 %v963_v38, %v959_v29  ;;  %v2370_v56 = vsub.f32 %v81_v21, %v963_v38  ;;  %v86_v31 = vld [vmem:[#allocation5 + $0x160] sm:$0xff]  ;;  %v91_v29 = vld [vmem:[#allocation5 + $0x188] sm:$0xff] }
  0x40   :  { %3212 = vst [vmem:[#allocation35_spill] sm:$0xff] %v2365_v1  ;;  %v2372_v9 = vpack.c.bf16 %v162_v3, %v158_v43  ;;  %v2374_v11 = vsub.f32 %v74_v30, %v158_v43  ;;  %v2376_v46 = vsub.f32 %v78_v0, %v162_v3  ;;  %v2378_v33 = vpack.c.bf16 %v965_v44, %v961_v4  ;;  %v95_v1 = vld [vmem:[#allocation5 + $0x1a8] sm:$0xff] }
  0x41   :  { %3213 = vst [vmem:[#allocation36_spill] sm:$0xff] %v2368_v27  ;;  %3214 = vst [vmem:[#allocation37_spill] sm:$0xff] %v2370_v56  ;;  %v2380_v25 = vsub.f32 %v76_v10, %v961_v4  ;;  %v2382_v23 = vsub.f32 %v80_v52, %v965_v44  ;;  %1935 = vmatprep.subr.bf16.mxu1 %v2368_v27  ;;  %v2386_v21 = vpack.c.bf16 %v168_v61, %v164_v20 }
  0x42   :  { %3215 = vst [vmem:[#allocation38_spill] sm:$0xff] %v2372_v9  ;;  %3216 = vst [vmem:[#allocation39_spill] sm:$0xff] %v2374_v11  ;;  %1769 = vmatpush1.bf16.msra.mxu0 %v2372_v9  ;;  %v2388_v30 = vsub.f32 %v83_v34, %v164_v20  ;;  %v2390_v38 = vsub.f32 %v87_v13, %v168_v61  ;;  %v967_v0 = vand.u32 4294901760, %v85_v48  ;;  %1937 = vmatpush1.bf16.msra.mxu1 %v2378_v33  ;;  %v97_v34 = vld [vmem:[#allocation5 + $0x1b8] sm:$0xff]  ;;  %v96_v11 = vld [vmem:[#allocation5 + $0x1b0] sm:$0xff] }
  0x43   :  { %3217 = vst [vmem:[#allocation40_spill] sm:$0xff] %v2376_v46  ;;  %3218 = vst [vmem:[#allocation41_spill] sm:$0xff] %v2378_v33  ;;  %v971_v10 = vand.u32 4294901760, %v89_v55  ;;  %v166_v52 = vand.u32 4294901760, %v82_v57  ;;  %v170_v43 = vand.u32 4294901760, %v86_v31  ;;  %v969_v3 = vand.u32 4294901760, %v84_v39  ;;  %1771 = vmatprep.subr.bf16.mxu0 %v2386_v21 }
  0x44   :  { %3219 = vst [vmem:[#allocation42_spill] sm:$0xff] %v2380_v25  ;;  %3220 = vst [vmem:[#allocation43_spill] sm:$0xff] %v2382_v23  ;;  %v2394_v4 = vsub.f32 %v85_v48, %v967_v0  ;;  %v973_v44 = vand.u32 4294901760, %v88_v16  ;;  %v172_v9 = vand.u32 4294901760, %v91_v29  ;;  %v176_v27 = vand.u32 4294901760, %v95_v1  ;;  %v93_v23 = vld [vmem:[#allocation5 + $0x198] sm:$0xff] }
  0x45   :  { %3221 = vst [vmem:[#allocation44_spill] sm:$0xff] %v2386_v21  ;;  %3222 = vst [vmem:[#allocation45_spill] sm:$0xff] %v2388_v30  ;;  %v2396_v20 = vpack.c.bf16 %v971_v10, %v967_v0  ;;  %v2398_v61 = vsub.f32 %v89_v55, %v971_v10  ;;  %v2400_v13 = vpack.c.bf16 %v170_v43, %v166_v52  ;;  %v94_v30 = vld [vmem:[#allocation5 + $0x1a0] sm:$0xff]  ;;  %v92_v25 = vld [vmem:[#allocation5 + $0x190] sm:$0xff]  ;;  %v975_v10 = vand.u32 4294901760, %v93_v23 }
  0x46   :  { %3223 = vst [vmem:[#allocation46_spill] sm:$0xff] %v2390_v38  ;;  %3224 = vst [vmem:[#allocation47_spill] sm:$0xff] %v2394_v4  ;;  %v2402_v33 = vsub.f32 %v82_v57, %v166_v52  ;;  %v90_v38 = vld [vmem:[#allocation5 + $0x180] sm:$0xff]  ;;  %v2404_v46 = vsub.f32 %v86_v31, %v170_v43  ;;  %v2406_v48 = vpack.c.bf16 %v973_v44, %v969_v3  ;;  %v979_v31 = vand.u32 4294901760, %v97_v34 }
  0x47   :  { %3225 = vst [vmem:[#allocation48_spill] sm:$0xff] %v2396_v20  ;;  %3226 = vst [vmem:[#allocation49_spill] sm:$0xff] %v2400_v13  ;;  %v2408_v21 = vsub.f32 %v84_v39, %v969_v3  ;;  %v2410_v4 = vsub.f32 %v88_v16, %v973_v44  ;;  %1939 = vmatprep.subr.bf16.mxu1 %v2396_v20  ;;  %1773 = vmatpush1.bf16.msra.mxu0 %v2400_v13  ;;  %v174_v52 = vand.u32 4294901760, %v90_v38 }
  0x48   :  { %3227 = vst [vmem:[#allocation50_spill] sm:$0xff] %v2406_v48  ;;  %v2414_v55 = vpack.c.bf16 %v176_v27, %v172_v9  ;;  %v2416_v57 = vsub.f32 %v91_v29, %v172_v9  ;;  %v2418_v0 = vsub.f32 %v95_v1, %v176_v27  ;;  %1941 = vmatpush1.bf16.msra.mxu1 %v2406_v48  ;;  %v178_v39 = vand.u32 4294901760, %v94_v30  ;;  %v41_v48 = vld [vmem:[#allocation2] sm:$0xff] }
  0x49   :  { %v977_v43 = vand.u32 4294901760, %v92_v25  ;;  %v2422_v16 = vsub.f32 %v93_v23, %v975_v10  ;;  %v981_v3 = vand.u32 4294901760, %v96_v11  ;;  %v3087_v44 = vand.u32 4294901760, %v2249_v17 }
  0x4a   :  { %3228 = vst [vmem:[#allocation51_spill] sm:$0xff] %v2414_v55  ;;  %3229 = vst [vmem:[#allocation52_spill] sm:$0xff] %v2416_v57  ;;  %1775 = vmatprep.subr.bf16.mxu0 %v2414_v55  ;;  %v3086_v13 = vand.u32 4294901760, %v2251_v18  ;;  %v2426_v9 = vpack.c.bf16 %v979_v31, %v975_v10  ;;  %v2428_v1 = vsub.f32 %v97_v34, %v979_v31  ;;  %v3095_v10 = vand.u32 4294901760, %v2257_v24 }
  0x4b   :  { %3230 = vst [vmem:[#allocation53_spill] sm:$0xff] %v2418_v0  ;;  %3231 = vst [vmem:[#allocation54_spill] sm:$0xff] %v2422_v16  ;;  %v2430_v27 = vpack.c.bf16 %v178_v39, %v174_v52  ;;  %v2432_v29 = vsub.f32 %v90_v38, %v174_v52  ;;  %v2434_v20 = vsub.f32 %v94_v30, %v178_v39  ;;  %v3090_v30 = vand.u32 4294901760, %v2253_v19 }
  0x4c   :  { %3232 = vst [vmem:[#allocation55_spill] sm:$0xff] %v2426_v9  ;;  %3233 = vst [vmem:[#allocation56_spill] sm:$0xff] %v2428_v1  ;;  %v2436_v0 = vpack.c.bf16 %v981_v3, %v977_v43  ;;  %v2438_v23 = vsub.f32 %v92_v25, %v977_v43  ;;  %v2440_v55 = vsub.f32 %v96_v11, %v981_v3  ;;  %1943 = vmatprep.subr.bf16.mxu1 %v2426_v9 }
  0x4d   :  { %3234 = vst [vmem:[#allocation57_spill] sm:$0xff] %v2430_v27  ;;  %3235 = vst [vmem:[#allocation58_spill] sm:$0xff] %v2432_v29  ;;  %1777 = vmatpush1.bf16.msra.mxu0 %v2430_v27  ;;  %v231_v34 = vsub.f32 %v2249_v17, %v3087_v44  ;;  %v243_v38 = vsub.f32 %v2251_v18, %v3086_v13  ;;  %v122_v25 = vsel %vm120_vm0, %v41_v48, 0  ;;  %v3102_v11 = vand.u32 4294901760, %v2261_v26 }
  0x4e   :  { %3236 = vst [vmem:[#allocation59_spill] sm:$0xff] %v2434_v20  ;;  %3237 = vst [vmem:[#allocation60_spill] sm:$0xff] %v2436_v0  ;;  %1945 = vmatpush1.bf16.msra.mxu1 %v2436_v0  ;;  %v3103_v31 = vand.u32 4294901760, %v2264_v28  ;;  %v1034_v3 = vsub.f32 %v2253_v19, %v3090_v30  ;;  %v1046_v13 = vsub.f32 %v2257_v24, %v3095_v10  ;;  %v2463_v44 = vand.u32 4294901760, %v122_v25 }
  0x4f   :  { %3238 = vst [vmem:[#allocation61_spill] sm:$0xff] %v2438_v23  ;;  %3239 = vst [vmem:[#allocation62_spill] sm:$0xff] %v2440_v55  ;;  %v232_v39 = vand.u32 4294901760, %v231_v34  ;;  %v244_v43 = vand.u32 4294901760, %v243_v38  ;;  %v237_v48 = vsub.f32 %v2261_v26, %v3102_v11  ;;  %v3241_v34 = vand.u32 4294901760, %v2270_v40 }
  0x50   :  { %3240 = vst [vmem:[#allocation63_spill] sm:$0xff] %v2463_v44  ;;  %v249_v52 = vsub.f32 %v2264_v28, %v3103_v31  ;;  %v1035_v30 = vand.u32 4294901760, %v1034_v3  ;;  %v1047_v27 = vand.u32 4294901760, %v1046_v13  ;;  %v3108_v9 = vand.u32 4294901760, %v2272_v41 }
  0x51   :  { %v1040_v38 = vsub.f32 %v2270_v40, %v3241_v34  ;;  %v1778_v0 = vpack.c.bf16 %v244_v43, %v232_v39  ;;  %v2476_v10 = vsub.f32 %v122_v25, %v2463_v44  ;;  %v238_v24 = vand.u32 4294901760, %v237_v48 }
  0x52   :  { %v250_v19 = vand.u32 4294901760, %v249_v52  ;;  %v1946_v11 = vpack.c.bf16 %v1047_v27, %v1035_v30  ;;  %v1052_v31 = vsub.f32 %v2272_v41, %v3108_v9  ;;  %v3107_v28 = vand.u32 4294901760, %v2274_v42 }
  0x53   :  { %3242 = vst [vmem:[#allocation64_spill] sm:$0xff] %v2476_v10  ;;  %v1041_v18 = vand.u32 4294901760, %v1040_v38  ;;  %1779 = vmatprep.subr.bf16.mxu0 %v1778_v0  ;;  %v3106_v39 = vand.u32 4294901760, %v2278_v47  ;;  %v2484_v13 = vand.u32 4294901760, %v2476_v10  ;;  %v3111_v25 = vand.u32 4294901760, %v2282_v49 }
  0x54   :  { %v1780_v43 = vpack.c.bf16 %v250_v19, %v238_v24  ;;  %v3116_v3 = vand.u32 4294901760, %v2285_v51  ;;  %1947 = vmatprep.subr.bf16.mxu1 %v1946_v11  ;;  %v1053_v52 = vand.u32 4294901760, %v1052_v31  ;;  %v255_v0 = vsub.f32 %v2274_v42, %v3107_v28 }
  0x55   :  { %3243 = vst [vmem:[#allocation65_spill] sm:$0xff] %v2484_v13  ;;  %v267_v27 = vsub.f32 %v2278_v47, %v3106_v39  ;;  %v3140_v30 = vand.u32 4294901760, %v2287_v53  ;;  %v220_v48 = vsub.f32 %v2476_v10, %v2484_v13  ;;  %v1058_v19 = vsub.f32 %v2282_v49, %v3111_v25 }
  0x56   :  { %v1070_v24 = vsub.f32 %v2285_v51, %v3116_v3  ;;  %v3138_v11 = vand.u32 4294901760, %v2293_v62  ;;  %v1948_v31 = vpack.c.bf16 %v1053_v52, %v1041_v18  ;;  %v256_v34 = vand.u32 4294901760, %v255_v0 }
  0x57   :  { %v268_v38 = vand.u32 4294901760, %v267_v27  ;;  %v261_v39 = vsub.f32 %v2287_v53, %v3140_v30  ;;  %v221_v28 = vand.u32 4294901760, %v220_v48  ;;  %v1059_v9 = vand.u32 4294901760, %v1058_v19 }
  0x58   :  { %v1071_v13 = vand.u32 4294901760, %v1070_v24  ;;  %v273_v25 = vsub.f32 %v2293_v62, %v3138_v11  ;;  %v3124_v3 = vand.u32 4294901760, %v2295_v63  ;;  %v3122_v51 = vand.u32 4294901760, %v2299_v6  ;;  %v3247_v11 = vld [vmem:[#allocation40_spill] sm:$0xff] }
  0x59   :  { %v1782_v10 = vpack.c.bf16 %v268_v38, %v256_v34  ;;  %v262_v44 = vand.u32 4294901760, %v261_v39  ;;  %222 = vmatmul.mubr.f32.vlgmr.msra.gmra.mrb[0].mxu0 %v221_v28  ;;  %1025 = vmatmul.mubr.f32.vlgmr.msra.gmra.mrb[0].mxu1 %v221_v28  ;;  %v3121_v0 = vand.u32 4294901760, %v2303_v8  ;;  %v3119_v27 = vand.u32 4294901760, %v2306_v12 }
  0x5a   :  { %v1950_v18 = vpack.c.bf16 %v1071_v13, %v1059_v9  ;;  %v274_v52 = vand.u32 4294901760, %v273_v25  ;;  %1781 = vmatpush1.bf16.msra.mxu0 %v1780_v43  ;;  %1949 = vmatpush1.bf16.msra.mxu1 %v1948_v31  ;;  %v1064_v48 = vsub.f32 %v2295_v63, %v3124_v3  ;;  %v1076_v39 = vsub.f32 %v2299_v6, %v3122_v51 }
  0x5b   :  { %v3120_v19 = vand.u32 4294901760, %v2310_v14  ;;  %v3123_v28 = vand.u32 4294901760, %v2312_v15  ;;  %1783 = vmatprep.subr.bf16.mxu0 %v1782_v10  ;;  %v279_v13 = vsub.f32 %v2303_v8, %v3121_v0  ;;  %v291_v43 = vsub.f32 %v2306_v12, %v3119_v27 }
  0x5c   :  { %1951 = vmatprep.subr.bf16.mxu1 %v1950_v18  ;;  %v1784_v9 = vpack.c.bf16 %v274_v52, %v262_v44  ;;  %v3125_v25 = vand.u32 4294901760, %v2319_v35  ;;  %v1065_v24 = vand.u32 4294901760, %v1064_v48  ;;  %v1077_v31 = vand.u32 4294901760, %v1076_v39 }
  0x5d   :  { %v1082_v34 = vsub.f32 %v2310_v14, %v3120_v19  ;;  %v1094_v44 = vsub.f32 %v2312_v15, %v3123_v28  ;;  %v3244_v10 = vmov 0.0   ;;  %v280_v38 = vand.u32 4294901760, %v279_v13 }
  0x5e   :  { %432 = vmatprep.mubr.f32.mxu0 %v3244_v10  ;;  %1235 = vmatprep.mubr.f32.mxu1 %v3244_v10  ;;  %v292_v18 = vand.u32 4294901760, %v291_v43  ;;  %v285_v52 = vsub.f32 %v2319_v35, %v3125_v25  ;;  %v3130_v48 = vand.u32 4294901760, %v2321_v36  ;;  %v1952_v39 = vpack.c.bf16 %v1077_v31, %v1065_v24 }
  0x5f   :  { %1785 = vmatpush1.bf16.msra.mxu0 %v1784_v9  ;;  %v1083_v27 = vand.u32 4294901760, %v1082_v34  ;;  %v1095_v19 = vand.u32 4294901760, %v1094_v44  ;;  %v3129_v0 = vand.u32 4294901760, %v2325_v45  ;;  %v3126_v13 = vand.u32 4294901760, %v2327_v50 }
  0x60   :  { %v1786_v51 = vpack.c.bf16 %v292_v18, %v280_v38  ;;  %v286_v28 = vand.u32 4294901760, %v285_v52  ;;  %v297_v3 = vsub.f32 %v2321_v36, %v3130_v48  ;;  %1953 = vmatpush1.bf16.msra.mxu1 %v1952_v39  ;;  %v3127_v9 = vand.u32 4294901760, %v2331_v54 }
  0x61   :  { %v1954_v43 = vpack.c.bf16 %v1095_v19, %v1083_v27  ;;  %v1088_v25 = vsub.f32 %v2325_v45, %v3129_v0  ;;  %v3128_v24 = vand.u32 4294901760, %v2335_v58  ;;  %v1100_v34 = vsub.f32 %v2327_v50, %v3126_v13 }
  0x62   :  { %1787 = vmatprep.subr.bf16.mxu0 %v1786_v51  ;;  %v298_v31 = vand.u32 4294901760, %v297_v3  ;;  %v3131_v44 = vand.u32 4294901760, %v2339_v60  ;;  %v3132_v38 = vand.u32 4294901760, %v2342_v2  ;;  %v303_v19 = vsub.f32 %v2331_v54, %v3127_v9 }
  0x63   :  { %1955 = vmatprep.subr.bf16.mxu1 %v1954_v43  ;;  %v1089_v27 = vand.u32 4294901760, %v1088_v25  ;;  %v315_v18 = vsub.f32 %v2335_v58, %v3128_v24  ;;  %v3133_v51 = vand.u32 4294901760, %v2345_v22  ;;  %v1101_v52 = vand.u32 4294901760, %v1100_v34 }
  0x64   :  { %v1788_v3 = vpack.c.bf16 %v298_v31, %v286_v28  ;;  %v1106_v39 = vsub.f32 %v2339_v60, %v3131_v44  ;;  %v1118_v25 = vsub.f32 %v2342_v2, %v3132_v38  ;;  %v304_v43 = vand.u32 4294901760, %v303_v19 }
  0x65   :  { %v316_v13 = vand.u32 4294901760, %v315_v18  ;;  %v309_v9 = vsub.f32 %v2345_v22, %v3133_v51  ;;  %v3136_v24 = vand.u32 4294901760, %v2349_v37  ;;  %v1956_v0 = vpack.c.bf16 %v1101_v52, %v1089_v27 }
  0x66   :  { %1789 = vmatpush1.bf16.msra.mxu0 %v1788_v3  ;;  %v1107_v28 = vand.u32 4294901760, %v1106_v39  ;;  %v1119_v31 = vand.u32 4294901760, %v1118_v25  ;;  %v3134_v34 = vand.u32 4294901760, %v2353_v32  ;;  %v3135_v19 = vand.u32 4294901760, %v2355_v59 }
  0x67   :  { %v1790_v48 = vpack.c.bf16 %v316_v13, %v304_v43  ;;  %v310_v44 = vand.u32 4294901760, %v309_v9  ;;  %v321_v38 = vsub.f32 %v2349_v37, %v3136_v24  ;;  %1957 = vmatpush1.bf16.msra.mxu1 %v1956_v0  ;;  %v3137_v27 = vand.u32 4294901760, %v2359_v5  ;;  %v3245_v9 = vld [vmem:[#allocation35_spill] sm:$0xff] }
  0x68   :  { %v1958_v18 = vpack.c.bf16 %v1119_v31, %v1107_v28  ;;  %v1112_v51 = vsub.f32 %v2353_v32, %v3134_v34  ;;  %v3139_v3 = vand.u32 4294901760, %v2361_v7  ;;  %v1124_v13 = vsub.f32 %v2355_v59, %v3135_v19 }
  0x69   :  { %1791 = vmatprep.subr.bf16.mxu0 %v1790_v48  ;;  %v322_v52 = vand.u32 4294901760, %v321_v38  ;;  %v3145_v39 = vand.u32 4294901760, %v3245_v9  ;;  %v3146_v25 = vand.u32 4294901760, %v2370_v56  ;;  %v327_v43 = vsub.f32 %v2359_v5, %v3137_v27  ;;  %v3246_v48 = vld [vmem:[#allocation39_spill] sm:$0xff] }
  0x6a   :  { %1959 = vmatprep.subr.bf16.mxu1 %v1958_v18  ;;  %v1113_v0 = vand.u32 4294901760, %v1112_v51  ;;  %v339_v28 = vsub.f32 %v2361_v7, %v3139_v3  ;;  %v3149_v38 = vand.u32 4294901760, %v3246_v48  ;;  %v1125_v34 = vand.u32 4294901760, %v1124_v13  ;;  %v3248_v13 = vld [vmem:[#allocation42_spill] sm:$0xff] }
  0x6b   :  { %v1792_v31 = vpack.c.bf16 %v322_v52, %v310_v44  ;;  %v1130_v19 = vsub.f32 %v3245_v9, %v3145_v39  ;;  %v1142_v51 = vsub.f32 %v2370_v56, %v3146_v25  ;;  %v328_v18 = vand.u32 4294901760, %v327_v43  ;;  %v3249_v43 = vld [vmem:[#allocation43_spill] sm:$0xff] }
  0x6c   :  { %v340_v24 = vand.u32 4294901760, %v339_v28  ;;  %v333_v27 = vsub.f32 %v3246_v48, %v3149_v38  ;;  %v3150_v3 = vand.u32 4294901760, %v3247_v11  ;;  %v1960_v30 = vpack.c.bf16 %v1125_v34, %v1113_v0 }
  0x6d   :  { %1793 = vmatpush1.bf16.msra.mxu0 %v1792_v31  ;;  %v1131_v44 = vand.u32 4294901760, %v1130_v19  ;;  %v1143_v52 = vand.u32 4294901760, %v1142_v51  ;;  %v3151_v7 = vand.u32 4294901760, %v3248_v13  ;;  %v3152_v28 = vand.u32 4294901760, %v3249_v43  ;;  %v3250_v31 = vld [vmem:[#allocation45_spill] sm:$0xff]  ;;  %v3251_v19 = vld [vmem:[#allocation46_spill] sm:$0xff] }
  0x6e   :  { %v1794_v5 = vpack.c.bf16 %v340_v24, %v328_v18  ;;  %v334_v39 = vand.u32 4294901760, %v333_v27  ;;  %v345_v25 = vsub.f32 %v3247_v11, %v3150_v3  ;;  %1961 = vmatpush1.bf16.msra.mxu1 %v1960_v30  ;;  %v3154_v34 = vand.u32 4294901760, %v3250_v31  ;;  %v3252_v27 = vld [vmem:[#allocation47_spill] sm:$0xff] }
  0x6f   :  { %v1962_v56 = vpack.c.bf16 %v1143_v52, %v1131_v44  ;;  %v1136_v38 = vsub.f32 %v3248_v13, %v3151_v7  ;;  %v3155_v0 = vand.u32 4294901760, %v3251_v19  ;;  %v1148_v24 = vsub.f32 %v3249_v43, %v3152_v28 }
  0x70   :  { %1795 = vmatprep.subr.bf16.mxu0 %v1794_v5  ;;  %v346_v51 = vand.u32 4294901760, %v345_v25  ;;  %v3158_v18 = vand.u32 4294901760, %v3252_v27  ;;  %v3159_v3 = vand.u32 4294901760, %v2398_v61  ;;  %v351_v44 = vsub.f32 %v3250_v31, %v3154_v34 }
  0x71   :  { %1963 = vmatprep.subr.bf16.mxu1 %v1962_v56  ;;  %v1137_v30 = vand.u32 4294901760, %v1136_v38  ;;  %v363_v52 = vsub.f32 %v3251_v19, %v3155_v0  ;;  %v3160_v5 = vand.u32 4294901760, %v2402_v33  ;;  %v1149_v7 = vand.u32 4294901760, %v1148_v24 }
  0x72   :  { %v1796_v25 = vpack.c.bf16 %v346_v51, %v334_v39  ;;  %v1154_v28 = vsub.f32 %v3252_v27, %v3158_v18  ;;  %v1166_v56 = vsub.f32 %v2398_v61, %v3159_v3  ;;  %v352_v38 = vand.u32 4294901760, %v351_v44 }
  0x73   :  { %v364_v43 = vand.u32 4294901760, %v363_v52  ;;  %v357_v34 = vsub.f32 %v2402_v33, %v3160_v5  ;;  %v3165_v0 = vand.u32 4294901760, %v2404_v46  ;;  %v1964_v19 = vpack.c.bf16 %v1149_v7, %v1137_v30 }
  0x74   :  { %1797 = vmatpush1.bf16.msra.mxu0 %v1796_v25  ;;  %v1155_v39 = vand.u32 4294901760, %v1154_v28  ;;  %v1167_v51 = vand.u32 4294901760, %v1166_v56  ;;  %v3162_v24 = vand.u32 4294901760, %v2408_v21  ;;  %v3161_v44 = vand.u32 4294901760, %v2410_v4  ;;  %v3253_v28 = vld [vmem:[#allocation53_spill] sm:$0xff] }
  0x75   :  { %v1798_v31 = vpack.c.bf16 %v364_v43, %v352_v38  ;;  %v358_v18 = vand.u32 4294901760, %v357_v34  ;;  %v369_v3 = vsub.f32 %v2404_v46, %v3165_v0  ;;  %1965 = vmatpush1.bf16.msra.mxu1 %v1964_v19  ;;  %v3163_v7 = vand.u32 4294901760, %v2416_v57 }
  0x76   :  { %v1966_v52 = vpack.c.bf16 %v1167_v51, %v1155_v39  ;;  %v1160_v5 = vsub.f32 %v2408_v21, %v3162_v24  ;;  %v3164_v30 = vand.u32 4294901760, %v3253_v28  ;;  %v1172_v43 = vsub.f32 %v2410_v4, %v3161_v44 }
  0x77   :  { %1799 = vmatprep.subr.bf16.mxu0 %v1798_v31  ;;  %v370_v25 = vand.u32 4294901760, %v369_v3  ;;  %v3167_v34 = vand.u32 4294901760, %v2422_v16  ;;  %v3168_v56 = vand.u32 4294901760, %v2428_v1  ;;  %v375_v38 = vsub.f32 %v2416_v57, %v3163_v7 }
  0x78   :  { %1967 = vmatprep.subr.bf16.mxu1 %v1966_v52  ;;  %v1161_v19 = vand.u32 4294901760, %v1160_v5  ;;  %v387_v39 = vsub.f32 %v3253_v28, %v3164_v30  ;;  %v3169_v3 = vand.u32 4294901760, %v2432_v29  ;;  %v1173_v51 = vand.u32 4294901760, %v1172_v43 }
  0x79   :  { %v1800_v31 = vpack.c.bf16 %v370_v25, %v358_v18  ;;  %v1178_v44 = vsub.f32 %v2422_v16, %v3167_v34  ;;  %v1190_v5 = vsub.f32 %v2428_v1, %v3168_v56  ;;  %v376_v52 = vand.u32 4294901760, %v375_v38 }
  0x7a   :  { %v388_v24 = vand.u32 4294901760, %v387_v39  ;;  %v381_v7 = vsub.f32 %v2432_v29, %v3169_v3  ;;  %v3172_v30 = vand.u32 4294901760, %v2434_v20  ;;  %v1968_v0 = vpack.c.bf16 %v1173_v51, %v1161_v19 }
  0x7b   :  { %1801 = vmatpush1.bf16.msra.mxu0 %v1800_v31  ;;  %v1179_v18 = vand.u32 4294901760, %v1178_v44  ;;  %v1191_v25 = vand.u32 4294901760, %v1190_v5  ;;  %v3170_v43 = vand.u32 4294901760, %v2438_v23  ;;  %v3171_v38 = vand.u32 4294901760, %v2440_v55 }
  0x7c   :  { %v1802_v28 = vpack.c.bf16 %v388_v24, %v376_v52  ;;  %v382_v34 = vand.u32 4294901760, %v381_v7  ;;  %v393_v56 = vsub.f32 %v2434_v20, %v3172_v30  ;;  %1969 = vmatpush1.bf16.msra.mxu1 %v1968_v0  ;;  %v3254_v7 = vld [vmem:[#allocation12_spill] sm:$0xff]  ;;  %v3255_v52 = vld [vmem:[#allocation13_spill] sm:$0xff]  ;;  %v3256_v0 = vld [vmem:[#allocation15_spill] sm:$0xff]  ;;  %v1986_v30 = vpack.c.bf16 %v2342_v2, %v2339_v60 }
  0x7d   :  { %v1970_v39 = vpack.c.bf16 %v1191_v25, %v1179_v18  ;;  %v1184_v3 = vsub.f32 %v2438_v23, %v3170_v43  ;;  %v1196_v44 = vsub.f32 %v2440_v55, %v3171_v38  ;;  %v1806_v31 = vpack.c.bf16 %v3254_v7, %v2249_v17  ;;  %v3257_v43 = vld [vmem:[#allocation17_spill] sm:$0xff] }
  0x7e   :  { %1803 = vmatprep.subr.bf16.mxu0 %v1802_v28  ;;  %v394_v19 = vand.u32 4294901760, %v393_v56  ;;  %v1974_v18 = vpack.c.bf16 %v3256_v0, %v3255_v52  ;;  %v1808_v28 = vpack.c.bf16 %v3257_v43, %v2261_v26  ;;  %v1976_v56 = vpack.c.bf16 %v2272_v41, %v2270_v40 }
  0x7f   :  { %1971 = vmatprep.subr.bf16.mxu1 %v1970_v39  ;;  %v1185_v24 = vand.u32 4294901760, %v1184_v3  ;;  %v1197_v5 = vand.u32 4294901760, %v1196_v44  ;;  %v1810_v3 = vpack.c.bf16 %v2278_v47, %v2274_v42  ;;  %v3258_v39 = vld [vmem:[#allocation21_spill] sm:$0xff]  ;;  %v1814_v44 = vpack.c.bf16 %v2306_v12, %v2303_v8 }
  0x80   :  { %v1804_v51 = vpack.c.bf16 %v394_v19, %v382_v34  ;;  %v1978_v38 = vpack.c.bf16 %v3258_v39, %v2282_v49  ;;  %v1812_v34 = vpack.c.bf16 %v2293_v62, %v2287_v53  ;;  %v1980_v19 = vpack.c.bf16 %v2299_v6, %v2295_v63 }
  0x81   :  { %v1972_v25 = vpack.c.bf16 %v1197_v5, %v1185_v24  ;;  %v1982_v24 = vpack.c.bf16 %v2312_v15, %v2310_v14  ;;  %v1984_v5 = vpack.c.bf16 %v2327_v50, %v2325_v45  ;;  %v3260_v55 = vand.u32 4294901760, %v2249_v17 }
  0x82   :  { %1805 = vmatpush1.bf16.msra.mxu0 %v1804_v51  ;;  %v1816_v51 = vpack.c.bf16 %v2321_v36, %v2319_v35  ;;  %v3262_v20 = vand.u32 4294901760, %v3255_v52  ;;  %v3263_v29 = vand.u32 4294901760, %v3256_v0  ;;  %v3265_v16 = vand.u32 4294901760, %v3257_v43 }
  0x83   :  { %1807 = vmatprep.subr.bf16.mxu0 %v1806_v31  ;;  %1973 = vmatpush1.bf16.msra.mxu1 %v1972_v25  ;;  %v3259_v31 = vld [vmem:[#allocation63_spill] sm:$0xff]  ;;  %v1818_v25 = vpack.c.bf16 %v2335_v58, %v2331_v54  ;;  %v3266_v17 = vand.u32 4294901760, %v2270_v40  ;;  %v3268_v52 = vand.u32 4294901760, %v2274_v42  ;;  %v3272_v40 = vand.u32 4294901760, %v2287_v53 }
  0x84   :  { %1975 = vmatprep.subr.bf16.mxu1 %v1974_v18  ;;  %v3261_v18 = vand.u32 4294901760, %v3254_v7  ;;  %v2720_v1 = vpack.c.bf16 %v3263_v29, %v3262_v20  ;;  %v3269_v20 = vand.u32 4294901760, %v2278_v47  ;;  %v3274_v42 = vand.u32 4294901760, %v2295_v63 }
  0x85   :  { %434 = vmatmul.mubr.f32.vlgmr.msra.gmra.mrb[0].mxu0 %v3259_v31  ;;  %v3275_v47 = vand.u32 4294901760, %v2299_v6  ;;  %v3279_v53 = vand.u32 4294901760, %v2312_v15  ;;  %v3281_v63 = vand.u32 4294901760, %v2321_v36 }
  0x86   :  { %1809 = vmatpush1.bf16.msra.mxu0 %v1808_v28  ;;  %560 = vmatprep.mubr.f32.mxu0 %v3244_v10  ;;  %v2714_v23 = vpack.c.bf16 %v3261_v18, %v3260_v55  ;;  %v3264_v28 = vand.u32 4294901760, %v2261_v26  ;;  %v3267_v55 = vand.u32 4294901760, %v2272_v41  ;;  %v2739_v29 = vpack.c.bf16 %v3269_v20, %v3268_v52 }
  0x87   :  { %1237 = vmatmul.mubr.f32.vlgmr.msra.gmra.mrb[0].mxu1 %v3259_v31  ;;  %1811 = vmatprep.subr.bf16.mxu0 %v1810_v3  ;;  %v3270_v26 = vand.u32 4294901760, %v2282_v49  ;;  %v3273_v41 = vand.u32 4294901760, %v2293_v62  ;;  %v2758_v3 = vpack.c.bf16 %v3275_v47, %v3274_v42  ;;  %v3277_v49 = vand.u32 4294901760, %v2306_v12 }
  0x88   :  { %v2727_v57 = vpack.c.bf16 %v3265_v16, %v3264_v28  ;;  %v2733_v7 = vpack.c.bf16 %v3267_v55, %v3266_v17  ;;  %1977 = vmatpush1.bf16.msra.mxu1 %v1976_v56  ;;  %1363 = vmatprep.mubr.f32.mxu1 %v3244_v10  ;;  %v3271_v16 = vand.u32 4294901760, %v3258_v39  ;;  %v3276_v56 = vand.u32 4294901760, %v2303_v8 }
  0x89   :  { %v2752_v0 = vpack.c.bf16 %v3273_v41, %v3272_v40  ;;  %1979 = vmatprep.subr.bf16.mxu1 %v1978_v38  ;;  %v3278_v18 = vand.u32 4294901760, %v2310_v14  ;;  %v3280_v28 = vand.u32 4294901760, %v2319_v35  ;;  %v3282_v38 = vand.u32 4294901760, %v2325_v45  ;;  %v3297_v41 = vld [vmem:[#allocation37_spill] sm:$0xff] }
  0x8a   :  { %v2746_v43 = vpack.c.bf16 %v3271_v16, %v3270_v26  ;;  %v2764_v39 = vpack.c.bf16 %v3277_v49, %v3276_v56  ;;  %v3283_v8 = vand.u32 4294901760, %v2327_v50  ;;  %1813 = vmatpush1.bf16.msra.mxu0 %v1812_v34  ;;  %v3284_v12 = vand.u32 4294901760, %v2331_v54 }
  0x8b   :  { %v2770_v62 = vpack.c.bf16 %v3279_v53, %v3278_v18  ;;  %v2776_v6 = vpack.c.bf16 %v3281_v63, %v3280_v28  ;;  %v3285_v14 = vand.u32 4294901760, %v2335_v58  ;;  %v3286_v55 = vand.u32 4294901760, %v2339_v60  ;;  %1815 = vmatprep.subr.bf16.mxu0 %v1814_v44  ;;  %v3292_v58 = vld [vmem:[#allocation33_spill] sm:$0xff]  ;;  %v3294_v60 = vld [vmem:[#allocation34_spill] sm:$0xff]  ;;  %v3302_v53 = vld [vmem:[#allocation43_spill] sm:$0xff] }
  0x8c   :  { %v2782_v17 = vpack.c.bf16 %v3283_v8, %v3282_v38  ;;  %v3287_v35 = vand.u32 4294901760, %v2342_v2  ;;  %v3288_v52 = vand.u32 4294901760, %v2345_v22  ;;  %v3289_v45 = vand.u32 4294901760, %v2349_v37  ;;  %1981 = vmatpush1.bf16.msra.mxu1 %v1980_v19  ;;  %v3305_v38 = vld [vmem:[#allocation45_spill] sm:$0xff] }
  0x8d   :  { %v2788_v15 = vpack.c.bf16 %v3285_v14, %v3284_v12  ;;  %v3290_v34 = vand.u32 4294901760, %v2353_v32  ;;  %v3291_v54 = vand.u32 4294901760, %v2355_v59  ;;  %v3293_v26 = vand.u32 4294901760, %v3292_v58  ;;  %v3307_v12 = vld [vmem:[#allocation46_spill] sm:$0xff]  ;;  %1983 = vmatprep.subr.bf16.mxu1 %v1982_v24 }
  0x8e   :  { %v2794_v36 = vpack.c.bf16 %v3287_v35, %v3286_v55  ;;  %v2800_v50 = vpack.c.bf16 %v3289_v45, %v3288_v52  ;;  %v3295_v16 = vand.u32 4294901760, %v3294_v60  ;;  %v3296_v40 = vand.u32 4294901760, %v3245_v9  ;;  %1817 = vmatpush1.bf16.msra.mxu0 %v1816_v51  ;;  %v3341_v51 = vld [vmem:[#allocation20_spill] sm:$0xff] }
  0x8f   :  { %v2806_v20 = vpack.c.bf16 %v3291_v54, %v3290_v34  ;;  %v3298_v42 = vand.u32 4294901760, %v3297_v41  ;;  %v3299_v56 = vand.u32 4294901760, %v3246_v48  ;;  %v3300_v49 = vand.u32 4294901760, %v3247_v11  ;;  %1819 = vmatprep.subr.bf16.mxu0 %v1818_v25  ;;  %v3343_v25 = vld [vmem:[#allocation24_spill] sm:$0xff] }
  0x90   :  { %v2812_v2 = vpack.c.bf16 %v3295_v16, %v3293_v26  ;;  %v3301_v44 = vand.u32 4294901760, %v3248_v13  ;;  %v3303_v28 = vand.u32 4294901760, %v3302_v53  ;;  %v3306_v8 = vand.u32 4294901760, %v3305_v38  ;;  %1985 = vmatpush1.bf16.msra.mxu1 %v1984_v5  ;;  %v3342_v5 = vld [vmem:[#allocation22_spill] sm:$0xff] }
  0x91   :  { %v2818_v47 = vpack.c.bf16 %v3298_v42, %v3296_v40  ;;  %v2824_v18 = vpack.c.bf16 %v3300_v49, %v3299_v56  ;;  %v3308_v14 = vand.u32 4294901760, %v3307_v12  ;;  %v3310_v35 = vand.u32 4294901760, %v3252_v27  ;;  %v3319_v42 = vld [vmem:[#allocation52_spill] sm:$0xff]  ;;  %v3321_v49 = vld [vmem:[#allocation53_spill] sm:$0xff]  ;;  %1987 = vmatprep.subr.bf16.mxu1 %v1986_v30  ;;  %v3340_v30 = vld [vmem:[#allocation18_spill] sm:$0xff] }
  0x92   :  { %v2830_v63 = vpack.c.bf16 %v3303_v28, %v3301_v44  ;;  %v3311_v52 = vand.u32 4294901760, %v2398_v61  ;;  %v3313_v34 = vand.u32 4294901760, %v2402_v33  ;;  %v3314_v54 = vand.u32 4294901760, %v2404_v46 }
  0x93   :  { %v2836_v55 = vpack.c.bf16 %v3308_v14, %v3306_v8  ;;  %v3316_v19 = vand.u32 4294901760, %v2408_v21  ;;  %v3317_v16 = vand.u32 4294901760, %v2410_v4  ;;  %v3320_v56 = vand.u32 4294901760, %v3319_v42  ;;  %v3323_v8 = vld [vmem:[#allocation54_spill] sm:$0xff] }
  0x94   :  { %3304 = vst [vmem:[#allocation35_spill] sm:$0xff] %v2830_v63  ;;  %v2842_v45 = vpack.c.bf16 %v3311_v52, %v3310_v35  ;;  %v2848_v26 = vpack.c.bf16 %v3314_v54, %v3313_v34  ;;  %v3322_v44 = vand.u32 4294901760, %v3321_v49  ;;  %v3324_v14 = vand.u32 4294901760, %v3323_v8  ;;  %v3325_v35 = vld [vmem:[#allocation56_spill] sm:$0xff]  ;;  %v3327_v34 = vld [vmem:[#allocation58_spill] sm:$0xff] }
  0x95   :  { %3309 = vst [vmem:[#allocation39_spill] sm:$0xff] %v2836_v55  ;;  %v2854_v40 = vpack.c.bf16 %v3317_v16, %v3316_v19  ;;  %v3326_v52 = vand.u32 4294901760, %v3325_v35  ;;  %v3328_v54 = vand.u32 4294901760, %v3327_v34  ;;  %v3331_v19 = vld [vmem:[#allocation61_spill] sm:$0xff]  ;;  %v3333_v16 = vld [vmem:[#allocation62_spill] sm:$0xff] }
  0x96   :  { %3312 = vst [vmem:[#allocation40_spill] sm:$0xff] %v2842_v45  ;;  %3315 = vst [vmem:[#allocation42_spill] sm:$0xff] %v2848_v26  ;;  %v2860_v28 = vpack.c.bf16 %v3322_v44, %v3320_v56  ;;  %v3329_v26 = vld [vmem:[#allocation59_spill] sm:$0xff]  ;;  %v3332_v24 = vand.u32 4294901760, %v3331_v19  ;;  %v1820_v56 = vpack.c.bf16 %v2349_v37, %v2345_v22  ;;  %v1822_v44 = vpack.c.bf16 %v3294_v60, %v3292_v58  ;;  %v3345_v60 = vld [vmem:[#allocation25_spill] sm:$0xff] }
  0x97   :  { %3318 = vst [vmem:[#allocation47_spill] sm:$0xff] %v2854_v40  ;;  %v2866_v31 = vpack.c.bf16 %v3326_v52, %v3324_v14  ;;  %v3330_v45 = vand.u32 4294901760, %v3329_v26  ;;  %v3334_v40 = vand.u32 4294901760, %v3333_v16  ;;  %v1988_v14 = vpack.c.bf16 %v2355_v59, %v2353_v32  ;;  %v3344_v58 = vld [vmem:[#allocation23_spill] sm:$0xff]  ;;  %v3355_v52 = vld [vmem:[#allocation44_spill] sm:$0xff] }
  0x98   :  { %1821 = vmatpush1.bf16.msra.mxu0 %v1820_v56  ;;  %v1826_v37 = vpack.c.bf16 %v3307_v12, %v3305_v38  ;;  %v1992_v22 = vpack.c.bf16 %v3302_v53, %v3248_v13  ;;  %v1994_v59 = vpack.c.bf16 %v2398_v61, %v3252_v27  ;;  %v1828_v32 = vpack.c.bf16 %v2404_v46, %v2402_v33  ;;  %v3335_v33 = vld [vmem:[#allocation11_spill] sm:$0xff]  ;;  %v3336_v13 = vld [vmem:[#allocation14_spill] sm:$0xff]  ;;  %v3347_v53 = vld [vmem:[#allocation28_spill] sm:$0xff] }
  0x99   :  { %v2872_v63 = vpack.c.bf16 %v3330_v45, %v3328_v54  ;;  %v2878_v55 = vpack.c.bf16 %v3334_v40, %v3332_v24  ;;  %v1990_v45 = vpack.c.bf16 %v3297_v41, %v3245_v9  ;;  %v1824_v40 = vpack.c.bf16 %v3247_v11, %v3246_v48  ;;  %1823 = vmatprep.subr.bf16.mxu0 %v1822_v44  ;;  %v3339_v27 = vld [vmem:[#allocation19_spill] sm:$0xff]  ;;  %v3346_v41 = vld [vmem:[#allocation26_spill] sm:$0xff]  ;;  %v3349_v12 = vld [vmem:[#allocation29_spill] sm:$0xff] }
  0x9a   :  { %1989 = vmatpush1.bf16.msra.mxu1 %v1988_v14  ;;  %v1830_v11 = vpack.c.bf16 %v3321_v49, %v3319_v42  ;;  %v1996_v9 = vpack.c.bf16 %v2410_v4, %v2408_v21  ;;  %v1998_v48 = vpack.c.bf16 %v3325_v35, %v3323_v8  ;;  %v1832_v61 = vpack.c.bf16 %v3329_v26, %v3327_v34  ;;  %v3337_v21 = vld [vmem:[#allocation64_spill] sm:$0xff]  ;;  %v3348_v38 = vld [vmem:[#allocation27_spill] sm:$0xff]  ;;  %v3350_v26 = vld [vmem:[#allocation30_spill] sm:$0xff] }
  0x9b   :  { %1991 = vmatprep.subr.bf16.mxu1 %v1990_v45  ;;  %v2000_v46 = vpack.c.bf16 %v3333_v16, %v3331_v19  ;;  %v3338_v4 = vld [vmem:[#allocation16_spill] sm:$0xff]  ;;  %v3352_v49 = vld [vmem:[#allocation31_spill] sm:$0xff]  ;;  %v3354_v35 = vld [vmem:[#allocation38_spill] sm:$0xff] }
  0x9c   :  { %1825 = vmatpush1.bf16.msra.mxu0 %v1824_v40  ;;  %v3351_v42 = vld [vmem:[#allocation32_spill] sm:$0xff]  ;;  %v3356_v34 = vld [vmem:[#allocation41_spill] sm:$0xff]  ;;  %v3359_v24 = vld [vmem:[#allocation51_spill] sm:$0xff] }
  0x9d   :  { %1827 = vmatprep.subr.bf16.mxu0 %v1826_v37  ;;  %v3353_v8 = vld [vmem:[#allocation36_spill] sm:$0xff]  ;;  %v3358_v19 = vld [vmem:[#allocation49_spill] sm:$0xff]  ;;  %v3360_v16 = vld [vmem:[#allocation50_spill] sm:$0xff] }
  0x9e   :  { %1993 = vmatpush1.bf16.msra.mxu1 %v1992_v22  ;;  %v3357_v54 = vld [vmem:[#allocation48_spill] sm:$0xff]  ;;  %v3361_v56 = vld [vmem:[#allocation55_spill] sm:$0xff]  ;;  %v3362_v44 = vld [vmem:[#allocation57_spill] sm:$0xff] }
  0x9f   :  { %1995 = vmatprep.subr.bf16.mxu1 %v1994_v59  ;;  %v3363_v14 = vld [vmem:[#allocation60_spill] sm:$0xff]  ;;  %v3364_v45 = vld [vmem:[#allocation65_spill] sm:$0xff] }
  0xa0   :  { %1829 = vmatpush1.bf16.msra.mxu0 %v1828_v32 }
  0xa1   :  { %1831 = vmatprep.subr.bf16.mxu0 %v1830_v11 }
  0xa2   :  { %1997 = vmatpush1.bf16.msra.mxu1 %v1996_v9 }
  0xa3   :  { %1999 = vmatprep.subr.bf16.mxu1 %v1998_v48 }
  0xa4   :  { %1833 = vmatpush1.bf16.msra.mxu0 %v1832_v61 }
  0xa5   :  { %1835 = vmatprep.subr.bf16.mxu0 %v3335_v33 }
  0xa6   :  { %2001 = vmatpush1.bf16.msra.mxu1 %v2000_v46 }
  0xa7   :  { %2003 = vmatprep.subr.bf16.mxu1 %v3336_v13  ;;  %563 = vmatmul.mubr.f32.vlgmr.msra.gmra.mrb[0].mxu0 %v3337_v21 }
  0xa8   :  { %1837 = vmatpush1.bf16.msra.mxu0 %v3338_v4  ;;  %661 = vmatprep.mubr.f32.mxu0 %v3244_v10 }
  0xa9   :  { %1366 = vmatmul.mubr.f32.vlgmr.msra.gmra.mrb[0].mxu1 %v3337_v21  ;;  %1839 = vmatprep.subr.bf16.mxu0 %v3339_v27 }
  0xaa   :  { %2005 = vmatpush1.bf16.msra.mxu1 %v3340_v30  ;;  %1464 = vmatprep.mubr.f32.mxu1 %v3244_v10 }
  0xab   :  { %2007 = vmatprep.subr.bf16.mxu1 %v3341_v51 }
  0xac   :  { %1841 = vmatpush1.bf16.msra.mxu0 %v3342_v5 }
  0xad   :  { %1843 = vmatprep.subr.bf16.mxu0 %v3343_v25 }
  0xae   :  { %2009 = vmatpush1.bf16.msra.mxu1 %v3344_v58 }
  0xaf   :  { %2011 = vmatprep.subr.bf16.mxu1 %v3345_v60 }
  0xb0   :  { %1845 = vmatpush1.bf16.msra.mxu0 %v3346_v41 }
  0xb1   :  { %1847 = vmatprep.subr.bf16.mxu0 %v3347_v53 }
  0xb2   :  { %2013 = vmatpush1.bf16.msra.mxu1 %v3348_v38 }
  0xb3   :  { %2015 = vmatprep.subr.bf16.mxu1 %v3349_v12 }
  0xb4   :  { %1849 = vmatpush1.bf16.msra.mxu0 %v3350_v26 }
  0xb5   :  { %1851 = vmatprep.subr.bf16.mxu0 %v3351_v42 }
  0xb6   :  { %2017 = vmatpush1.bf16.msra.mxu1 %v3352_v49 }
  0xb7   :  { %2019 = vmatprep.subr.bf16.mxu1 %v3353_v8 }
  0xb8   :  { %1853 = vmatpush1.bf16.msra.mxu0 %v3354_v35 }
  0xb9   :  { %1855 = vmatprep.subr.bf16.mxu0 %v3355_v52 }
  0xba   :  { %2021 = vmatpush1.bf16.msra.mxu1 %v3356_v34 }
  0xbb   :  { %2023 = vmatprep.subr.bf16.mxu1 %v3357_v54 }
  0xbc   :  { %1857 = vmatpush1.bf16.msra.mxu0 %v3358_v19 }
  0xbd   :  { %1859 = vmatprep.subr.bf16.mxu0 %v3359_v24 }
  0xbe   :  { %2025 = vmatpush1.bf16.msra.mxu1 %v3360_v16 }
  0xbf   :  { %2027 = vmatprep.subr.bf16.mxu1 %v3361_v56 }
  0xc0   :  { %1861 = vmatpush1.bf16.msra.mxu0 %v3362_v44 }
  0xc1   :  { %1863 = vmatprep.subr.bf16.mxu0 %v2714_v23  ;;  %v3367_v23 = vld [vmem:[#allocation40_spill] sm:$0xff] }
  0xc2   :  { %2029 = vmatpush1.bf16.msra.mxu1 %v3363_v14 }
  0xc3   :  { %2031 = vmatprep.subr.bf16.mxu1 %v2720_v1  ;;  %665 = vmatmul.mubr.f32.vlgmr.msra.gmra.mrb[0].mxu0 %v3364_v45  ;;  %v3366_v1 = vld [vmem:[#allocation35_spill] sm:$0xff] }
  0xc4   :  { %1865 = vmatpush1.bf16.msra.mxu0 %v2727_v57  ;;  %819 = vmatprep.mubr.f32.mxu0 %v3244_v10  ;;  %v3365_v57 = vld [vmem:[#allocation39_spill] sm:$0xff] }
  0xc5   :  { %1468 = vmatmul.mubr.f32.vlgmr.msra.gmra.mrb[0].mxu1 %v3364_v45  ;;  %1867 = vmatprep.subr.bf16.mxu0 %v2739_v29  ;;  %v3369_v29 = vld [vmem:[#allocation47_spill] sm:$0xff] }
  0xc6   :  { %2033 = vmatpush1.bf16.msra.mxu1 %v2733_v7  ;;  %1622 = vmatprep.mubr.f32.mxu1 %v3244_v10  ;;  %v3368_v7 = vld [vmem:[#allocation42_spill] sm:$0xff] }
  0xc7   :  { %2035 = vmatprep.subr.bf16.mxu1 %v2746_v43  ;;  %v3370_v43 = vld [vmem:[#allocation63_spill] sm:$0xff] }
  0xc8   :  { %1869 = vmatpush1.bf16.msra.mxu0 %v2752_v0 }
  0xc9   :  { %1871 = vmatprep.subr.bf16.mxu0 %v2764_v39 }
  0xca   :  { %2037 = vmatpush1.bf16.msra.mxu1 %v2758_v3  ;;  %v98_v3 = vld [vmem:[%s3023_s2] sm:$0xf]  ;;  %s2160_s2 = scalar_lea.vmem %s1741_s12, 512 }
  0xcb   :  { %2039 = vmatprep.subr.bf16.mxu1 %v2770_v62  ;;  %p2161_p2 = scmp.ne.s32.totalorder %s1741_s12, %s2160_s2  ;;  %p2166_p4 = scmp.lt.s32.totalorder %s2160_s2, %s2160_s2 }
  0xcc   :  { %1873 = vmatpush1.bf16.msra.mxu0 %v2776_v6 }
  0xcd   :  { %1875 = vmatprep.subr.bf16.mxu0 %v2788_v15  ;;  %p2167_p5 = por %p2166_p4, %p2165_p3 }
  0xce   :  { %2041 = vmatpush1.bf16.msra.mxu1 %v2782_v17 }
  0xcf   :  { %2043 = vmatprep.subr.bf16.mxu1 %v2794_v36  ;;  %p2168_p6 = pnand %p2167_p5, %p2161_p2 }
  0xd0   :  { %1877 = vmatpush1.bf16.msra.mxu0 %v2800_v50 }
  0xd1   :  { %1879 = vmatprep.subr.bf16.mxu0 %v2812_v2 }
  0xd2   :  { %2045 = vmatpush1.bf16.msra.mxu1 %v2806_v20 }
  0xd3   :  { %2047 = vmatprep.subr.bf16.mxu1 %v2818_v47 }
  0xd4   :  { %1881 = vmatpush1.bf16.msra.mxu0 %v2824_v18 }
  0xd5   :  { %1883 = vmatprep.subr.bf16.mxu0 %v3365_v57 }
  0xd6   :  { %2049 = vmatpush1.bf16.msra.mxu1 %v3366_v1 }
  0xd7   :  { %2051 = vmatprep.subr.bf16.mxu1 %v3367_v23 }
  0xd8   :  { %1885 = vmatpush1.bf16.msra.mxu0 %v3368_v7 }
  0xd9   :  { %1887 = vmatprep.subr.bf16.mxu0 %v2860_v28 }
  0xda   :  { %2053 = vmatpush1.bf16.msra.mxu1 %v3369_v29 }
  0xdb   :  { %2055 = vmatprep.subr.bf16.mxu1 %v2866_v31 }
  0xdc   :  { %1889 = vmatpush1.bf16.msra.mxu0 %v2872_v63 }
  0xdd   :  { %1891 = vmatprep.subr.bf16.mxu0 %v3335_v33 }
  0xde   :  { %2057 = vmatpush1.bf16.msra.mxu1 %v2878_v55 }
  0xdf   :  { %2059 = vmatprep.subr.bf16.mxu1 %v3336_v13  ;;  %821 = vmatmul.mubr.f32.vlgmr.msra.gmra.mrb[0].mxu0 %v3370_v43 }
  0xe0   :  { %1893 = vmatpush1.bf16.msra.mxu0 %v3338_v4  ;;  %919 = vmatprep.mubr.f32.mxu0 %v3244_v10 }
  0xe1   :  { %1624 = vmatmul.mubr.f32.vlgmr.msra.gmra.mrb[0].mxu1 %v3370_v43  ;;  %1895 = vmatprep.subr.bf16.mxu0 %v3339_v27 }
  0xe2   :  { %2061 = vmatpush1.bf16.msra.mxu1 %v3340_v30  ;;  %1722 = vmatprep.mubr.f32.mxu1 %v3244_v10  ;;  %v100_v10 = vlaneseq }
  0xe3   :  { %2063 = vmatprep.subr.bf16.mxu1 %v3341_v51 }
  0xe4   :  { %1897 = vmatpush1.bf16.msra.mxu0 %v3342_v5  ;;  %v101_v31 = vshrl.u32 %v100_v10, 7 }
  0xe5   :  { %1899 = vmatprep.subr.bf16.mxu0 %v3343_v25 }
  0xe6   :  { %2065 = vmatpush1.bf16.msra.mxu1 %v3344_v58  ;;  %v102_v0 = vsub.s32 0, %v101_v31  ;;  %v106_v39 = vsub.s32 1, %v101_v31  ;;  %v110_v62 = vsub.s32 2, %v101_v31  ;;  %v114_v6 = vsub.s32 3, %v101_v31 }
  0xe7   :  { %2067 = vmatprep.subr.bf16.mxu1 %v3345_v60 }
  0xe8   :  { %1901 = vmatpush1.bf16.msra.mxu0 %v3346_v41  ;;  %v103_v17 = vrot.slane %v98_v3, %v102_v0  ;;  %v107_v15 = vrot.slane %v98_v3, %v106_v39  ;;  %v111_v36 = vrot.slane %v98_v3, %v110_v62  ;;  %v115_v20 = vrot.slane %v98_v3, %v114_v6 }
  0xe9   :  { %1903 = vmatprep.subr.bf16.mxu0 %v3347_v53 }
  0xea   :  { %2069 = vmatpush1.bf16.msra.mxu1 %v3348_v38 }
  0xeb   :  { %2071 = vmatprep.subr.bf16.mxu1 %v3349_v12 }
  0xec   :  { %1905 = vmatpush1.bf16.msra.mxu0 %v3350_v26 }
  0xed   :  { %1907 = vmatprep.subr.bf16.mxu0 %v3351_v42 }
  0xee   :  { %2073 = vmatpush1.bf16.msra.mxu1 %v3352_v49 }
  0xef   :  { %2075 = vmatprep.subr.bf16.mxu1 %v3353_v8 }
  0xf0   :  { %1909 = vmatpush1.bf16.msra.mxu0 %v3354_v35 }
  0xf1   :  { %1911 = vmatprep.subr.bf16.mxu0 %v3355_v52 }
  0xf2   :  { %2077 = vmatpush1.bf16.msra.mxu1 %v3356_v34 }
  0xf3   :  { %2079 = vmatprep.subr.bf16.mxu1 %v3357_v54 }
  0xf4   :  { %1913 = vmatpush1.bf16.msra.mxu0 %v3358_v19 }
  0xf5   :  { %1915 = vmatprep.subr.bf16.mxu0 %v3359_v24 }
  0xf6   :  { %2081 = vmatpush1.bf16.msra.mxu1 %v3360_v16 }
  0xf7   :  { %2083 = vmatprep.subr.bf16.mxu1 %v3361_v56 }
  0xf8   :  { %1917 = vmatpush1.bf16.msra.mxu0 %v3362_v44 }
  0xfa   :  { %2085 = vmatpush1.bf16.msra.mxu1 %v3363_v14 }
  0xfb   :  { %921 = vmatmul.mubr.f32.vlgmr.msra.gmra.mrb[0].mxu0 %v3370_v43 }
  0xfd   :  { %1724 = vmatmul.mubr.f32.vlgmr.msra.gmra.mrb[0].mxu1 %v3370_v43 }
 0x1ce   :  { %v922_v50 = vpop.f32.mrb[0].mxu0 }
 0x1cf   :  { %v2086_v2 = vadd.f32 %v922_v50, %v103_v17  ;;  %v924_v47 = vpop.f32.mrb[1].mxu0 }
 0x1d0   :  { %v1725_v18 = vpop.f32.mrb[0].mxu1  ;;  %v2087_v63 = vadd.f32 %v924_v47, %v107_v15 }
 0x1d1   :  { %1730 = vst [vmem:[#allocation7] sm:$0xff] %v2086_v2  ;;  %v2088_v55 = vadd.f32 %v1725_v18, %v111_v36  ;;  %v1727_v28 = vpop.f32.mrb[1].mxu1 }
 0x1d2   :  { %1731 = vst [vmem:[#allocation7 + $0x8] sm:$0xff] %v2087_v63  ;;  %v2089_v40 = vadd.f32 %v1727_v28, %v115_v20 }
 0x1d3   :  { %1732 = vst [vmem:[#allocation7 + $0x10] sm:$0xff] %v2088_v55 }
 0x1d4   :  { %1733 = vst [vmem:[#allocation7 + $0x18] sm:$0xff] %v2089_v40 }
 0x1d5   :  { %2171 = shalt.err (!%p2168_p6)
}
 0x1d6   :  { %s2172_s15 = scalar_lea.hbm %s3024_s3, 512 }
 0x1d7   :  { %p2173_p7 = scmp.ne.s32.totalorder %s3024_s3, %s2172_s15  ;;  %p2176_p8 = scmp.lt.u32.totalorder %s2172_s15, %s3024_s3 }
 0x1d9   :  { %p2178_p9 = pnand %p2176_p8, %p2173_p7 }
 0x1db   :  { %2181 = shalt.err (!%p2178_p9)
}
 0x1dc   :  { %1743 = dma.vmem_to_hbm [thread:$0]  %s1741_s12, 512, %s3024_s3, [#allocation4]  }
 0x1dd   :  { %2186 = dma.done.wait [#allocation4], 512  }
 0x1de   :  { %2187 = vsyncadd [#allocation4], 4294966784 }
 0x1df   :  { %1747 = vsyncpa [#allocation3], 1 }
 0x1e0   :  { %1748 = vsyncpa [#allocation6], 1 }
 0x1e1   :  { %1749 = vsyncpa [#allocation4], 1 }

</bundles_post_ra>
